<compile_context>
chip_gen: v7x
topology: tpu7x:2x2x1
jax: 0.10.0
libtpu: 0.0.40
codegen_flags: <defaults>
</compile_context>

<pallas_src>
import math

import jax
import jax.numpy as jnp
from jax.experimental import pallas as pl
from jax.experimental.pallas import tpu as pltpu

OUT_PAD = 128  # lane-dense output block width


# ------------------------------ fused kernel -------------------------------

def _fused_forward_kernel(x_ref, w1_ref, b1_ref, w2_ref, b2_ref,
                          w3s_ref, b3s_ref, w4s_ref, b4s_ref,
                          w5_ref, b5_ref, o_ref):
    """Entire Model_relu forward on one batch tile.  BN is pre-folded into the
    Linear weights/biases, Dropout(p=0) is identity."""
    # pre: fc1(+BN folded) -> ReLU -> fc2(+BN folded) -> ReLU
    h = jnp.dot(x_ref[...], w1_ref[...],
                preferred_element_type=jnp.float32) + b1_ref[...]
    h = jnp.maximum(h, 0.0)
    h = jnp.dot(h, w2_ref[...],
                preferred_element_type=jnp.float32) + b2_ref[...]
    h = jnp.maximum(h, 0.0)

    # 4 residual layers (identity shortcut), statically unrolled.
    num_layers = w3s_ref.shape[0]
    for l in range(num_layers):
        r = h
        h = jnp.dot(h, w3s_ref[l],
                    preferred_element_type=jnp.float32) + b3s_ref[l]
        h = jnp.maximum(h, 0.0)
        h = jnp.dot(h, w4s_ref[l],
                    preferred_element_type=jnp.float32) + b4s_ref[l]
        h = jnp.maximum(h + r, 0.0)

    # head: fc5 has N=1 -> do it on the VPU (multiply + lane reduction) instead
    # of burning an MXU push for 1/128 output lanes.  w5_ref is (1, hid).
    y = jnp.sum(h * w5_ref[...], axis=-1, keepdims=True) + b5_ref[...]
    y = jnp.maximum(y, 0.0)                      # outer F.relu of Model_relu
    # Lane-dense store: broadcast across the 128-lane block; wrapper keeps
    # only column 0.  Avoids a 1-valid-lane masked vst.msk.
    o_ref[...] = jnp.broadcast_to(y, o_ref.shape)


# ------------------------- parameter initialization ------------------------

def _kaiming_linear(key, in_dim, out_dim):
    """PyTorch kaiming_normal_ (fan_in, relu gain) on weight, zero bias.
    Weight returned already transposed to (in_dim, out_dim)."""
    std = math.sqrt(2.0 / in_dim)
    w = std * jax.random.normal(key, (in_dim, out_dim), jnp.float32)
    b = jnp.zeros((1, out_dim), jnp.float32)
    return w, b


def _bn_affine(key, dim, eps=1e-5):
    """Synthetic BatchNorm1d stats (eval mode) folded to per-feature (scale, shift)."""
    k1, k2, k3, k4 = jax.random.split(key, 4)
    gamma = 1.0 + 0.1 * jax.random.normal(k1, (1, dim), jnp.float32)
    beta = 0.1 * jax.random.normal(k2, (1, dim), jnp.float32)
    mean = 0.1 * jax.random.normal(k3, (1, dim), jnp.float32)
    var = 1.0 + 0.1 * jax.random.uniform(k4, (1, dim), jnp.float32)
    scale = gamma / jnp.sqrt(var + eps)
    shift = beta - mean * scale
    return scale, shift


def init_params(key, input_size, output_size=1, embedding_size=100,
                hidden_size=20, num_layers=4):
    """Raw (un-folded) params mirroring the PyTorch module layout."""
    # fc1, bn1, fc2, bn2, (fc3, bn3, fc4, bn4) x num_layers, fc5
    n_keys = 5 + 4 * num_layers
    keys = jax.random.split(key, n_keys)
    ki = iter(range(n_keys))
    p = {}
    p["w1"], p["b1"] = _kaiming_linear(keys[next(ki)], input_size, embedding_size)
    p["s1"], p["t1"] = _bn_affine(keys[next(ki)], embedding_size)
    p["w2"], p["b2"] = _kaiming_linear(keys[next(ki)], embedding_size, hidden_size)
    p["s2"], p["t2"] = _bn_affine(keys[next(ki)], hidden_size)
    p["res"] = []
    for _ in range(num_layers):
        w3, b3 = _kaiming_linear(keys[next(ki)], hidden_size, hidden_size)
        s3, t3 = _bn_affine(keys[next(ki)], hidden_size)
        w4, b4 = _kaiming_linear(keys[next(ki)], hidden_size, hidden_size)
        s4, t4 = _bn_affine(keys[next(ki)], hidden_size)
        p["res"].append((w3, b3, s3, t3, w4, b4, s4, t4))
    p["w5"], p["b5"] = _kaiming_linear(keys[next(ki)], hidden_size, output_size)
    return p


def fold_params(p):
    """Fold each BatchNorm affine (scale, shift) into its preceding Linear,
    zero-pad the embedding dim to a multiple of 8, stack the residual layers,
    and pre-transpose the N=1 head weight to a (1, hid) row."""
    f = {}
    w1 = p["w1"] * p["s1"]                          # column-wise scale
    b1 = p["b1"] * p["s1"] + p["t1"]
    w2 = p["w2"] * p["s2"]
    b2 = p["b2"] * p["s2"] + p["t2"]

    # Pad embedding dim 100 -> 104 (multiple of 8).  Padded fc1 columns /
    # biases and fc2 rows are zero, so padded features are exactly 0 through
    # the ReLU and contribute nothing -> results unchanged.
    emb = w1.shape[1]
    pad = (-emb) % 8
    if pad:
        w1 = jnp.pad(w1, ((0, 0), (0, pad)))
        b1 = jnp.pad(b1, ((0, 0), (0, pad)))
        w2 = jnp.pad(w2, ((0, pad), (0, 0)))
    f["w1"], f["b1"], f["w2"], f["b2"] = w1, b1, w2, b2

    w3s, b3s, w4s, b4s = [], [], [], []
    for (w3, b3, s3, t3, w4, b4, s4, t4) in p["res"]:
        w3s.append(w3 * s3)
        b3s.append(b3 * s3 + t3)
        w4s.append(w4 * s4)
        b4s.append(b4 * s4 + t4)
    f["w3s"] = jnp.stack(w3s)                       # (L, hid, hid)
    f["b3s"] = jnp.stack(b3s)                       # (L, 1, hid)
    f["w4s"] = jnp.stack(w4s)                       # (L, hid, hid)
    f["b4s"] = jnp.stack(b4s)                       # (L, 1, hid)

    f["w5_row"] = p["w5"].T                         # (1, hid) for VPU head
    f["b5"] = p["b5"]                               # (1, 1)
    return f


# --------------------------------- forward ---------------------------------

@jax.jit
def model_relu_forward(x, fp):
    """Single fused pallas_call over a 1-D batch grid."""
    batch, in_dim = x.shape
    out_dim = fp["b5"].shape[1]
    hid = fp["w2"].shape[1]
    emb = fp["w1"].shape[1]
    num_layers = fp["w3s"].shape[0]

    # Tile choice:
    #  * batch <= 8: one full block (dispatch-latency bound anyway).
    #  * batch > 8:  >= 2 steps so the "parallel" batch axis shards across both
    #    v7x TensorCores; tiles are multiples of 8 sublanes, capped at 4096
    #    rows (a (4096, 128) f32 activation + weights is a few MB of VMEM).
    if batch <= 8:
        tile_b = batch
    else:
        tile_b = min(4096, max(8, ((pl.cdiv(batch, 2) + 7) // 8) * 8))
    grid = (pl.cdiv(batch, tile_b),)

    def _resident(a):
        # Full-block weight spec whose block index never changes -> weight
        # stays VMEM-resident across all grid steps (no re-DMA).
        return pl.BlockSpec(a.shape, lambda i, _nd=a.ndim: (0,) * _nd)

    args = (x, fp["w1"], fp["b1"], fp["w2"], fp["b2"],
            fp["w3s"], fp["b3s"], fp["w4s"], fp["b4s"],
            fp["w5_row"], fp["b5"])

    in_specs = [pl.BlockSpec((tile_b, in_dim), lambda i: (i, 0))]
    in_specs += [_resident(a) for a in args[1:]]

    flops = 2 * batch * (in_dim * emb + emb * hid
                         + num_layers * 2 * hid * hid + hid)
    bytes_accessed = 4 * (x.size + sum(int(a.size) for a in args[1:])
                          + batch * OUT_PAD)

    out = pl.pallas_call(
        _fused_forward_kernel,
        out_shape=jax.ShapeDtypeStruct((batch, OUT_PAD), jnp.float32),
        grid=grid,
        in_specs=in_specs,
        out_specs=pl.BlockSpec((tile_b, OUT_PAD), lambda i: (i, 0)),
        compiler_params=pltpu.CompilerParams(
            dimension_semantics=("parallel",)),   # shards batch across TCs on v7x
        cost_estimate=pl.CostEstimate(flops=flops, transcendentals=0,
                                      bytes_accessed=bytes_accessed),
    )(*args)
    return out[:, :out_dim]                        # keep only the real column


def model_relu_reference(x, p):
    """Pure-JAX reference mirroring the PyTorch forward (eval mode), using the
    RAW (un-folded, un-padded) params — validates BN folding, the embedding
    padding and the fused kernel."""
    h = x @ p["w1"] + p["b1"]
    h = jnp.maximum(h * p["s1"] + p["t1"], 0.0)
    h = h @ p["w2"] + p["b2"]
    h = jnp.maximum(h * p["s2"] + p["t2"], 0.0)
    for (w3, b3, s3, t3, w4, b4, s4, t4) in p["res"]:
        r = h
        h = jnp.maximum((h @ w3 + b3) * s3 + t3, 0.0)
        h = (h @ w4 + b4) * s4 + t4
        h = jnp.maximum(h + r, 0.0)
    y = h @ p["w5"] + p["b5"]
    return jnp.maximum(y, 0.0)


if __name__ == "__main__":
    key = jax.random.PRNGKey(0)
    kx, kp = jax.random.split(key)

    batch, input_size = 8, 16
    x = jax.random.normal(kx, (batch, input_size), jnp.float32)

    raw_params = init_params(kp, input_size=input_size, output_size=1,
                             embedding_size=100, hidden_size=20, num_layers=4)
    fused_params = fold_params(raw_params)

    y = model_relu_forward(x, fused_params)
    y = jax.block_until_ready(y)

    y_ref = model_relu_reference(x, raw_params)
    assert y.shape == (batch, 1), y.shape
    assert jnp.allclose(y, y_ref, atol=1e-3, rtol=1e-3), "mismatch vs reference"

    print("KERNEL_OK")
</pallas_src>

<mosaic_0001>
module attributes {stable_mosaic.version = 11 : i64} {
  func.func @_fused_forward_kernel(%arg0: i32, %arg1: memref<8x16xf32, #tpu.memory_space<vmem>>, %arg2: memref<16x104xf32, #tpu.memory_space<vmem>>, %arg3: memref<1x104xf32, #tpu.memory_space<vmem>>, %arg4: memref<104x20xf32, #tpu.memory_space<vmem>>, %arg5: memref<1x20xf32, #tpu.memory_space<vmem>>, %arg6: memref<4x20x20xf32, #tpu.memory_space<vmem>>, %arg7: memref<4x1x20xf32, #tpu.memory_space<vmem>>, %arg8: memref<4x20x20xf32, #tpu.memory_space<vmem>>, %arg9: memref<4x1x20xf32, #tpu.memory_space<vmem>>, %arg10: memref<1x20xf32, #tpu.memory_space<vmem>>, %arg11: memref<1x1xf32, #tpu.memory_space<vmem>>, %arg12: memref<8x128xf32, #tpu.memory_space<vmem>>) attributes {dimension_semantics = [#tpu.dimension_semantics<parallel>], iteration_bounds = array<i64: 1>, scalar_prefetch = 0 : i64, scratch_operands = 0 : i64, tpu.core_type = #tpu.core_type<tc>, window_params = [{transform_indices = @transform_0, window_bounds = array<i64: 8, 16>}, {pipeline_mode = #tpu.pipeline_mode<synchronous>, transform_indices = @transform_1, window_bounds = array<i64: 16, 104>}, {pipeline_mode = #tpu.pipeline_mode<synchronous>, transform_indices = @transform_2, window_bounds = array<i64: 1, 104>}, {pipeline_mode = #tpu.pipeline_mode<synchronous>, transform_indices = @transform_3, window_bounds = array<i64: 104, 20>}, {pipeline_mode = #tpu.pipeline_mode<synchronous>, transform_indices = @transform_4, window_bounds = array<i64: 1, 20>}, {pipeline_mode = #tpu.pipeline_mode<synchronous>, transform_indices = @transform_5, window_bounds = array<i64: 4, 20, 20>}, {pipeline_mode = #tpu.pipeline_mode<synchronous>, transform_indices = @transform_6, window_bounds = array<i64: 4, 1, 20>}, {pipeline_mode = #tpu.pipeline_mode<synchronous>, transform_indices = @transform_7, window_bounds = array<i64: 4, 20, 20>}, {pipeline_mode = #tpu.pipeline_mode<synchronous>, transform_indices = @transform_8, window_bounds = array<i64: 4, 1, 20>}, {pipeline_mode = #tpu.pipeline_mode<synchronous>, transform_indices = @transform_9, window_bounds = array<i64: 1, 20>}, {pipeline_mode = #tpu.pipeline_mode<synchronous>, transform_indices = @transform_10, window_bounds = array<i64: 1, 1>}, {transform_indices = @transform_11, window_bounds = array<i64: 8, 128>}]} {
    %c0 = arith.constant 0 : index
    %c0_0 = arith.constant 0 : index
    %0 = vector.load %arg1[%c0, %c0_0] : memref<8x16xf32, #tpu.memory_space<vmem>>, vector<8x16xf32>
    %c0_1 = arith.constant 0 : index
    %c0_2 = arith.constant 0 : index
    %1 = vector.load %arg2[%c0_1, %c0_2] : memref<16x104xf32, #tpu.memory_space<vmem>>, vector<16x104xf32>
    %cst = arith.constant dense<0.000000e+00> : vector<8x104xf32>
    %2 = tpu.matmul %0, %1, %cst {dimension_numbers = #tpu.dot_dimension_numbers<[1], [0], [0], [1], [0, 0, 1, 1], [], []>} : vector<8x16xf32>, vector<16x104xf32>, vector<8x104xf32> -> vector<8x104xf32>
    %c0_3 = arith.constant 0 : index
    %c0_4 = arith.constant 0 : index
    %3 = vector.load %arg3[%c0_3, %c0_4] : memref<1x104xf32, #tpu.memory_space<vmem>>, vector<1x104xf32>
    %4 = vector.broadcast %3 : vector<1x104xf32> to vector<8x104xf32>
    %5 = arith.addf %2, %4 : vector<8x104xf32>
    %cst_5 = arith.constant 0.000000e+00 : f32
    %6 = vector.broadcast %cst_5 : f32 to vector<8x104xf32>
    %7 = arith.maximumf %5, %6 : vector<8x104xf32>
    %c0_6 = arith.constant 0 : index
    %c0_7 = arith.constant 0 : index
    %8 = vector.load %arg4[%c0_6, %c0_7] : memref<104x20xf32, #tpu.memory_space<vmem>>, vector<104x20xf32>
    %cst_8 = arith.constant dense<0.000000e+00> : vector<8x20xf32>
    %9 = tpu.matmul %7, %8, %cst_8 {dimension_numbers = #tpu.dot_dimension_numbers<[1], [0], [0], [1], [0, 0, 1, 1], [], []>} : vector<8x104xf32>, vector<104x20xf32>, vector<8x20xf32> -> vector<8x20xf32>
    %c0_9 = arith.constant 0 : index
    %c0_10 = arith.constant 0 : index
    %10 = vector.load %arg5[%c0_9, %c0_10] : memref<1x20xf32, #tpu.memory_space<vmem>>, vector<1x20xf32>
    %11 = vector.broadcast %10 : vector<1x20xf32> to vector<8x20xf32>
    %12 = arith.addf %9, %11 : vector<8x20xf32>
    %cst_11 = arith.constant 0.000000e+00 : f32
    %13 = vector.broadcast %cst_11 : f32 to vector<8x20xf32>
    %14 = arith.maximumf %12, %13 : vector<8x20xf32>
    %c0_12 = arith.constant 0 : index
    %c0_13 = arith.constant 0 : index
    %c0_14 = arith.constant 0 : index
    %15 = vector.load %arg6[%c0_12, %c0_13, %c0_14] : memref<4x20x20xf32, #tpu.memory_space<vmem>>, vector<1x20x20xf32>
    %16 = vector.shape_cast %15 : vector<1x20x20xf32> to vector<20x20xf32>
    %cst_15 = arith.constant dense<0.000000e+00> : vector<8x20xf32>
    %17 = tpu.matmul %14, %16, %cst_15 {dimension_numbers = #tpu.dot_dimension_numbers<[1], [0], [0], [1], [0, 0, 1, 1], [], []>} : vector<8x20xf32>, vector<20x20xf32>, vector<8x20xf32> -> vector<8x20xf32>
    %c0_16 = arith.constant 0 : index
    %c0_17 = arith.constant 0 : index
    %c0_18 = arith.constant 0 : index
    %18 = vector.load %arg7[%c0_16, %c0_17, %c0_18] : memref<4x1x20xf32, #tpu.memory_space<vmem>>, vector<1x1x20xf32>
    %19 = vector.shape_cast %18 : vector<1x1x20xf32> to vector<1x20xf32>
    %20 = vector.broadcast %19 : vector<1x20xf32> to vector<8x20xf32>
    %21 = arith.addf %17, %20 : vector<8x20xf32>
    %cst_19 = arith.constant 0.000000e+00 : f32
    %22 = vector.broadcast %cst_19 : f32 to vector<8x20xf32>
    %23 = arith.maximumf %21, %22 : vector<8x20xf32>
    %c0_20 = arith.constant 0 : index
    %c0_21 = arith.constant 0 : index
    %c0_22 = arith.constant 0 : index
    %24 = vector.load %arg8[%c0_20, %c0_21, %c0_22] : memref<4x20x20xf32, #tpu.memory_space<vmem>>, vector<1x20x20xf32>
    %25 = vector.shape_cast %24 : vector<1x20x20xf32> to vector<20x20xf32>
    %cst_23 = arith.constant dense<0.000000e+00> : vector<8x20xf32>
    %26 = tpu.matmul %23, %25, %cst_23 {dimension_numbers = #tpu.dot_dimension_numbers<[1], [0], [0], [1], [0, 0, 1, 1], [], []>} : vector<8x20xf32>, vector<20x20xf32>, vector<8x20xf32> -> vector<8x20xf32>
    %c0_24 = arith.constant 0 : index
    %c0_25 = arith.constant 0 : index
    %c0_26 = arith.constant 0 : index
    %27 = vector.load %arg9[%c0_24, %c0_25, %c0_26] : memref<4x1x20xf32, #tpu.memory_space<vmem>>, vector<1x1x20xf32>
    %28 = vector.shape_cast %27 : vector<1x1x20xf32> to vector<1x20xf32>
    %29 = vector.broadcast %28 : vector<1x20xf32> to vector<8x20xf32>
    %30 = arith.addf %26, %29 : vector<8x20xf32>
    %31 = arith.addf %30, %14 : vector<8x20xf32>
    %cst_27 = arith.constant 0.000000e+00 : f32
    %32 = vector.broadcast %cst_27 : f32 to vector<8x20xf32>
    %33 = arith.maximumf %31, %32 : vector<8x20xf32>
    %c1 = arith.constant 1 : index
    %c0_28 = arith.constant 0 : index
    %c0_29 = arith.constant 0 : index
    %34 = vector.load %arg6[%c1, %c0_28, %c0_29] : memref<4x20x20xf32, #tpu.memory_space<vmem>>, vector<1x20x20xf32>
    %35 = vector.shape_cast %34 : vector<1x20x20xf32> to vector<20x20xf32>
    %cst_30 = arith.constant dense<0.000000e+00> : vector<8x20xf32>
    %36 = tpu.matmul %33, %35, %cst_30 {dimension_numbers = #tpu.dot_dimension_numbers<[1], [0], [0], [1], [0, 0, 1, 1], [], []>} : vector<8x20xf32>, vector<20x20xf32>, vector<8x20xf32> -> vector<8x20xf32>
    %c1_31 = arith.constant 1 : index
    %c0_32 = arith.constant 0 : index
    %c0_33 = arith.constant 0 : index
    %37 = vector.load %arg7[%c1_31, %c0_32, %c0_33] : memref<4x1x20xf32, #tpu.memory_space<vmem>>, vector<1x1x20xf32>
    %38 = vector.shape_cast %37 : vector<1x1x20xf32> to vector<1x20xf32>
    %39 = vector.broadcast %38 : vector<1x20xf32> to vector<8x20xf32>
    %40 = arith.addf %36, %39 : vector<8x20xf32>
    %cst_34 = arith.constant 0.000000e+00 : f32
    %41 = vector.broadcast %cst_34 : f32 to vector<8x20xf32>
    %42 = arith.maximumf %40, %41 : vector<8x20xf32>
    %c1_35 = arith.constant 1 : index
    %c0_36 = arith.constant 0 : index
    %c0_37 = arith.constant 0 : index
    %43 = vector.load %arg8[%c1_35, %c0_36, %c0_37] : memref<4x20x20xf32, #tpu.memory_space<vmem>>, vector<1x20x20xf32>
    %44 = vector.shape_cast %43 : vector<1x20x20xf32> to vector<20x20xf32>
    %cst_38 = arith.constant dense<0.000000e+00> : vector<8x20xf32>
    %45 = tpu.matmul %42, %44, %cst_38 {dimension_numbers = #tpu.dot_dimension_numbers<[1], [0], [0], [1], [0, 0, 1, 1], [], []>} : vector<8x20xf32>, vector<20x20xf32>, vector<8x20xf32> -> vector<8x20xf32>
    %c1_39 = arith.constant 1 : index
    %c0_40 = arith.constant 0 : index
    %c0_41 = arith.constant 0 : index
    %46 = vector.load %arg9[%c1_39, %c0_40, %c0_41] : memref<4x1x20xf32, #tpu.memory_space<vmem>>, vector<1x1x20xf32>
    %47 = vector.shape_cast %46 : vector<1x1x20xf32> to vector<1x20xf32>
    %48 = vector.broadcast %47 : vector<1x20xf32> to vector<8x20xf32>
    %49 = arith.addf %45, %48 : vector<8x20xf32>
    %50 = arith.addf %49, %33 : vector<8x20xf32>
    %cst_42 = arith.constant 0.000000e+00 : f32
    %51 = vector.broadcast %cst_42 : f32 to vector<8x20xf32>
    %52 = arith.maximumf %50, %51 : vector<8x20xf32>
    %c2 = arith.constant 2 : index
    %c0_43 = arith.constant 0 : index
    %c0_44 = arith.constant 0 : index
    %53 = vector.load %arg6[%c2, %c0_43, %c0_44] : memref<4x20x20xf32, #tpu.memory_space<vmem>>, vector<1x20x20xf32>
    %54 = vector.shape_cast %53 : vector<1x20x20xf32> to vector<20x20xf32>
    %cst_45 = arith.constant dense<0.000000e+00> : vector<8x20xf32>
    %55 = tpu.matmul %52, %54, %cst_45 {dimension_numbers = #tpu.dot_dimension_numbers<[1], [0], [0], [1], [0, 0, 1, 1], [], []>} : vector<8x20xf32>, vector<20x20xf32>, vector<8x20xf32> -> vector<8x20xf32>
    %c2_46 = arith.constant 2 : index
    %c0_47 = arith.constant 0 : index
    %c0_48 = arith.constant 0 : index
    %56 = vector.load %arg7[%c2_46, %c0_47, %c0_48] : memref<4x1x20xf32, #tpu.memory_space<vmem>>, vector<1x1x20xf32>
    %57 = vector.shape_cast %56 : vector<1x1x20xf32> to vector<1x20xf32>
    %58 = vector.broadcast %57 : vector<1x20xf32> to vector<8x20xf32>
    %59 = arith.addf %55, %58 : vector<8x20xf32>
    %cst_49 = arith.constant 0.000000e+00 : f32
    %60 = vector.broadcast %cst_49 : f32 to vector<8x20xf32>
    %61 = arith.maximumf %59, %60 : vector<8x20xf32>
    %c2_50 = arith.constant 2 : index
    %c0_51 = arith.constant 0 : index
    %c0_52 = arith.constant 0 : index
    %62 = vector.load %arg8[%c2_50, %c0_51, %c0_52] : memref<4x20x20xf32, #tpu.memory_space<vmem>>, vector<1x20x20xf32>
    %63 = vector.shape_cast %62 : vector<1x20x20xf32> to vector<20x20xf32>
    %cst_53 = arith.constant dense<0.000000e+00> : vector<8x20xf32>
    %64 = tpu.matmul %61, %63, %cst_53 {dimension_numbers = #tpu.dot_dimension_numbers<[1], [0], [0], [1], [0, 0, 1, 1], [], []>} : vector<8x20xf32>, vector<20x20xf32>, vector<8x20xf32> -> vector<8x20xf32>
    %c2_54 = arith.constant 2 : index
    %c0_55 = arith.constant 0 : index
    %c0_56 = arith.constant 0 : index
    %65 = vector.load %arg9[%c2_54, %c0_55, %c0_56] : memref<4x1x20xf32, #tpu.memory_space<vmem>>, vector<1x1x20xf32>
    %66 = vector.shape_cast %65 : vector<1x1x20xf32> to vector<1x20xf32>
    %67 = vector.broadcast %66 : vector<1x20xf32> to vector<8x20xf32>
    %68 = arith.addf %64, %67 : vector<8x20xf32>
    %69 = arith.addf %68, %52 : vector<8x20xf32>
    %cst_57 = arith.constant 0.000000e+00 : f32
    %70 = vector.broadcast %cst_57 : f32 to vector<8x20xf32>
    %71 = arith.maximumf %69, %70 : vector<8x20xf32>
    %c3 = arith.constant 3 : index
    %c0_58 = arith.constant 0 : index
    %c0_59 = arith.constant 0 : index
    %72 = vector.load %arg6[%c3, %c0_58, %c0_59] : memref<4x20x20xf32, #tpu.memory_space<vmem>>, vector<1x20x20xf32>
    %73 = vector.shape_cast %72 : vector<1x20x20xf32> to vector<20x20xf32>
    %cst_60 = arith.constant dense<0.000000e+00> : vector<8x20xf32>
    %74 = tpu.matmul %71, %73, %cst_60 {dimension_numbers = #tpu.dot_dimension_numbers<[1], [0], [0], [1], [0, 0, 1, 1], [], []>} : vector<8x20xf32>, vector<20x20xf32>, vector<8x20xf32> -> vector<8x20xf32>
    %c3_61 = arith.constant 3 : index
    %c0_62 = arith.constant 0 : index
    %c0_63 = arith.constant 0 : index
    %75 = vector.load %arg7[%c3_61, %c0_62, %c0_63] : memref<4x1x20xf32, #tpu.memory_space<vmem>>, vector<1x1x20xf32>
    %76 = vector.shape_cast %75 : vector<1x1x20xf32> to vector<1x20xf32>
    %77 = vector.broadcast %76 : vector<1x20xf32> to vector<8x20xf32>
    %78 = arith.addf %74, %77 : vector<8x20xf32>
    %cst_64 = arith.constant 0.000000e+00 : f32
    %79 = vector.broadcast %cst_64 : f32 to vector<8x20xf32>
    %80 = arith.maximumf %78, %79 : vector<8x20xf32>
    %c3_65 = arith.constant 3 : index
    %c0_66 = arith.constant 0 : index
    %c0_67 = arith.constant 0 : index
    %81 = vector.load %arg8[%c3_65, %c0_66, %c0_67] : memref<4x20x20xf32, #tpu.memory_space<vmem>>, vector<1x20x20xf32>
    %82 = vector.shape_cast %81 : vector<1x20x20xf32> to vector<20x20xf32>
    %cst_68 = arith.constant dense<0.000000e+00> : vector<8x20xf32>
    %83 = tpu.matmul %80, %82, %cst_68 {dimension_numbers = #tpu.dot_dimension_numbers<[1], [0], [0], [1], [0, 0, 1, 1], [], []>} : vector<8x20xf32>, vector<20x20xf32>, vector<8x20xf32> -> vector<8x20xf32>
    %c3_69 = arith.constant 3 : index
    %c0_70 = arith.constant 0 : index
    %c0_71 = arith.constant 0 : index
    %84 = vector.load %arg9[%c3_69, %c0_70, %c0_71] : memref<4x1x20xf32, #tpu.memory_space<vmem>>, vector<1x1x20xf32>
    %85 = vector.shape_cast %84 : vector<1x1x20xf32> to vector<1x20xf32>
    %86 = vector.broadcast %85 : vector<1x20xf32> to vector<8x20xf32>
    %87 = arith.addf %83, %86 : vector<8x20xf32>
    %88 = arith.addf %87, %71 : vector<8x20xf32>
    %cst_72 = arith.constant 0.000000e+00 : f32
    %89 = vector.broadcast %cst_72 : f32 to vector<8x20xf32>
    %90 = arith.maximumf %88, %89 : vector<8x20xf32>
    %c0_73 = arith.constant 0 : index
    %c0_74 = arith.constant 0 : index
    %91 = vector.load %arg10[%c0_73, %c0_74] : memref<1x20xf32, #tpu.memory_space<vmem>>, vector<1x20xf32>
    %92 = vector.broadcast %91 : vector<1x20xf32> to vector<8x20xf32>
    %93 = arith.mulf %90, %92 : vector<8x20xf32>
    %cst_75 = arith.constant dense<0.000000e+00> : vector<8xf32>
    %94 = vector.multi_reduction <add>, %93, %cst_75 [1] : vector<8x20xf32> to vector<8xf32>
    %95 = vector.shape_cast %94 : vector<8xf32> to vector<8x1xf32>
    %c0_76 = arith.constant 0 : index
    %c0_77 = arith.constant 0 : index
    %96 = vector.load %arg11[%c0_76, %c0_77] : memref<1x1xf32, #tpu.memory_space<vmem>>, vector<1x1xf32>
    %97 = vector.broadcast %96 : vector<1x1xf32> to vector<8x1xf32>
    %98 = arith.addf %95, %97 : vector<8x1xf32>
    %cst_78 = arith.constant 0.000000e+00 : f32
    %99 = vector.broadcast %cst_78 : f32 to vector<8x1xf32>
    %100 = arith.maximumf %98, %99 : vector<8x1xf32>
    %101 = vector.shape_cast %100 : vector<8x1xf32> to vector<8x1xf32>
    %102 = vector.broadcast %101 : vector<8x1xf32> to vector<8x128xf32>
    %c0_79 = arith.constant 0 : index
    %c0_80 = arith.constant 0 : index
    %103 = vector.load %arg12[%c0_79, %c0_80] : memref<8x128xf32, #tpu.memory_space<vmem>>, vector<8x128xf32>
    tpu.vector_store %arg12[%c0_79, %c0_80], %102 {strides = array<i32>} : memref<8x128xf32, #tpu.memory_space<vmem>>, vector<8x128xf32>,
    return
  }
  func.func @transform_0(%arg0: i32) -> (i32, i32) {
    %c0_i32 = arith.constant 0 : i32
    %c0_i32_0 = arith.constant 0 : i32
    return %arg0, %c0_i32 : i32, i32
  }
  func.func @transform_1(%arg0: i32) -> (i32, i32) {
    %c0_i32 = arith.constant 0 : i32
    %c0_i32_0 = arith.constant 0 : i32
    %c0_i32_1 = arith.constant 0 : i32
    return %c0_i32, %c0_i32_0 : i32, i32
  }
  func.func @transform_2(%arg0: i32) -> (i32, i32) {
    %c0_i32 = arith.constant 0 : i32
    %c0_i32_0 = arith.constant 0 : i32
    %c0_i32_1 = arith.constant 0 : i32
    return %c0_i32, %c0_i32_0 : i32, i32
  }
  func.func @transform_3(%arg0: i32) -> (i32, i32) {
    %c0_i32 = arith.constant 0 : i32
    %c0_i32_0 = arith.constant 0 : i32
    %c0_i32_1 = arith.constant 0 : i32
    return %c0_i32, %c0_i32_0 : i32, i32
  }
  func.func @transform_4(%arg0: i32) -> (i32, i32) {
    %c0_i32 = arith.constant 0 : i32
    %c0_i32_0 = arith.constant 0 : i32
    %c0_i32_1 = arith.constant 0 : i32
    return %c0_i32, %c0_i32_0 : i32, i32
  }
  func.func @transform_5(%arg0: i32) -> (i32, i32, i32) {
    %c0_i32 = arith.constant 0 : i32
    %c0_i32_0 = arith.constant 0 : i32
    %c0_i32_1 = arith.constant 0 : i32
    %c0_i32_2 = arith.constant 0 : i32
    return %c0_i32, %c0_i32_0, %c0_i32_1 : i32, i32, i32
  }
  func.func @transform_6(%arg0: i32) -> (i32, i32, i32) {
    %c0_i32 = arith.constant 0 : i32
    %c0_i32_0 = arith.constant 0 : i32
    %c0_i32_1 = arith.constant 0 : i32
    %c0_i32_2 = arith.constant 0 : i32
    return %c0_i32, %c0_i32_0, %c0_i32_1 : i32, i32, i32
  }
  func.func @transform_7(%arg0: i32) -> (i32, i32, i32) {
    %c0_i32 = arith.constant 0 : i32
    %c0_i32_0 = arith.constant 0 : i32
    %c0_i32_1 = arith.constant 0 : i32
    %c0_i32_2 = arith.constant 0 : i32
    return %c0_i32, %c0_i32_0, %c0_i32_1 : i32, i32, i32
  }
  func.func @transform_8(%arg0: i32) -> (i32, i32, i32) {
    %c0_i32 = arith.constant 0 : i32
    %c0_i32_0 = arith.constant 0 : i32
    %c0_i32_1 = arith.constant 0 : i32
    %c0_i32_2 = arith.constant 0 : i32
    return %c0_i32, %c0_i32_0, %c0_i32_1 : i32, i32, i32
  }
  func.func @transform_9(%arg0: i32) -> (i32, i32) {
    %c0_i32 = arith.constant 0 : i32
    %c0_i32_0 = arith.constant 0 : i32
    %c0_i32_1 = arith.constant 0 : i32
    return %c0_i32, %c0_i32_0 : i32, i32
  }
  func.func @transform_10(%arg0: i32) -> (i32, i32) {
    %c0_i32 = arith.constant 0 : i32
    %c0_i32_0 = arith.constant 0 : i32
    %c0_i32_1 = arith.constant 0 : i32
    return %c0_i32, %c0_i32_0 : i32, i32
  }
  func.func @transform_11(%arg0: i32) -> (i32, i32) {
    %c0_i32 = arith.constant 0 : i32
    %c0_i32_0 = arith.constant 0 : i32
    return %arg0, %c0_i32 : i32, i32
  }
}

</mosaic_0001>

<bundles_post_ra>
// kernel: model_relu_forward.1
= control target key start
LH: loop header
LB: loop body
LE: loop exit
PB: predicated region body
PF: predicated region fallthrough
CT: control target
= control target key end

     0   :  { %v1225_v0 = vmov 0.0|0.0   ;;  %vm1226_vm0 = vmmov 0   ;;  %v1227_v3 = vmov 0.0   ;;  %vm50_vm1 = vcmask 130048   ;;  %s1509_s1 = inlined_call_operand.vmem [shape: f32[16,104], index: 1, kind: input, shape index: {}]   ;;  %s1510_s3 = inlined_call_operand.vmem [shape: f32[104,20], index: 3, kind: input, shape index: {}]   ;;  %s1511_s0 = inlined_call_operand.vmem [shape: f32[8,16], index: 0, kind: input, shape index: {}]   ;;  %s1512_s5 = inlined_call_operand.vmem [shape: f32[4,20,20], index: 5, kind: input, shape index: {}]   ;;  %s1513_s2 = inlined_call_operand.vmem [shape: f32[1,104], index: 2, kind: input, shape index: {}]   ;;  %s1514_s4 = inlined_call_operand.vmem [shape: f32[1,20], index: 4, kind: input, shape index: {}]   ;;  %s1515_s7 = inlined_call_operand.vmem [shape: f32[4,20,20], index: 7, kind: input, shape index: {}]   ;;  %s1516_s6 = inlined_call_operand.vmem [shape: f32[4,1,20], index: 6, kind: input, shape index: {}]   ;;  %s1517_s8 = inlined_call_operand.vmem [shape: f32[4,1,20], index: 8, kind: input, shape index: {}]   ;;  %s1518_s10 = inlined_call_operand.<no memory space> [shape: f32[1,1], index: 10, kind: input, shape index: {}]   ;;  %s1519_s9 = inlined_call_operand.vmem [shape: f32[1,20], index: 9, kind: input, shape index: {}]   ;;  %s1520_s11 = inlined_call_operand.vmem [shape: f32[8,128], index: 11, kind: output, shape index: {}]  }
   0x1   :  { %1175 = vmatprep.subr.bf16.mxu0 %v1225_v0  ;;  %v41_v1 = vld [vmem:[%s1509_s1] sm:$0xff]  ;;  %v42_v2 = vld [vmem:[%s1509_s1 + $0x8] sm:$0xff]  ;;  %1071 = vmatprep.mubr.msk.f32.mxu0 %vm1226_vm0, %v1227_v3  ;;  %v127_v7 = vld [vmem:[%s1510_s3 + $0x10] sm:$0xff]  ;;  %vm145_vm2 = vcmask 850944   ;;  %vm234_vm3 = vcmask 1043456   ;;  %vm230_vm4 = vcmask 162816  }
   0x2   :  { %v1176_v4 = vpack.c.bf16 %v42_v2, %v41_v1  ;;  %1178 = vmatprep.subr.bf16.mxu1 %v1225_v0  ;;  %v125_v5 = vld [vmem:[%s1510_s3] sm:$0xff]  ;;  %v126_v6 = vld [vmem:[%s1510_s3 + $0x8] sm:$0xff]  ;;  %1100 = vmatprep.mubr.msk.f32.mxu1 %vm1226_vm0, %v1227_v3  ;;  %v128_v9 = vld [vmem:[%s1510_s3 + $0x18] sm:$0xff] }
   0x3   :  { %v1179_v8 = vpack.c.bf16 %v126_v6, %v125_v5  ;;  %v40_v10 = vld [vmem:[%s1511_s0] sm:$0xff]  ;;  %v1182_v11 = vpack.c.bf16 %v128_v9, %v127_v7  ;;  %v130_v13 = vld [vmem:[%s1510_s3 + $0x28] sm:$0xff]  ;;  %v131_v15 = vld [vmem:[%s1510_s3 + $0x30] sm:$0xff] }
   0x4   :  { %1177 = vmatpush3.bf16.msra.mxu0 %v1176_v4  ;;  %v129_v12 = vld [vmem:[%s1510_s3 + $0x20] sm:$0xff]  ;;  %v132_v16 = vld [vmem:[%s1510_s3 + $0x38] sm:$0xff]  ;;  %v134_v19 = vld [vmem:[%s1510_s3 + $0x48] sm:$0xff] }
   0x5   :  { %1180 = vmatpush3.bf16.msra.mxu1 %v1179_v8  ;;  %1196 = vmatprep.subr.bf16.mxu0 %v1225_v0  ;;  %v1185_v14 = vpack.c.bf16 %v130_v13, %v129_v12  ;;  %v1188_v17 = vpack.c.bf16 %v132_v16, %v131_v15  ;;  %v133_v18 = vld [vmem:[%s1510_s3 + $0x40] sm:$0xff]  ;;  %v135_v21 = vld [vmem:[%s1510_s3 + $0x50] sm:$0xff]  ;;  %v136_v22 = vld [vmem:[%s1510_s3 + $0x58] sm:$0xff] }
   0x6   :  { %1181 = vmatprep.subr.bf16.mxu1 %v1225_v0  ;;  %v1191_v20 = vpack.c.bf16 %v134_v19, %v133_v18  ;;  %v1194_v23 = vpack.c.bf16 %v136_v22, %v135_v21  ;;  %v137_v24 = vld [vmem:[%s1510_s3 + $0x60] sm:$0xff]  ;;  %v221_v26 = vld [vmem:[%s1512_s5 + $0x8] sm:$0xff]  ;;  %v222_v33 = vld [vmem:[%s1512_s5 + $0x10] sm:$0xf] }
   0x7   :  { %1072 = vmatmul.mubr.msk.f32.vlgmr.msra.gmra.mrb[0].mxu0 %vm50_vm1, %v40_v10  ;;  %v220_v25 = vld [vmem:[%s1512_s5] sm:$0xff]  ;;  %v310_v36 = vld [vmem:[%s1515_s7 + $0x8] sm:$0xff]  ;;  %v311_v42 = vld [vmem:[%s1515_s7 + $0x10] sm:$0xf] }
   0x8   :  { %1109 = vmatprep.mubr.msk.f32.mxu0 %vm1226_vm0, %v1227_v3  ;;  %v1197_v27 = vpack.c.bf16 %v221_v26, %v220_v25  ;;  %v964_v28 = vld [vmem:[%s1513_s2] ss:$0 sm:$0xff]  ;;  %v974_v48 = vld [vmem:[%s1512_s5 + $0x18] sm:$0xff]  ;;  %v976_v51 = vld [vmem:[%s1512_s5 + $0x28] sm:$0xf] }
   0x9   :  { %1183 = vmatpush3.bf16.msra.mxu1 %v1182_v11  ;;  %v966_v34 = vld [vmem:[%s1514_s4] ss:$0 sm:$0xff]  ;;  %v981_v56 = vld [vmem:[%s1515_s7 + $0x18] sm:$0xff]  ;;  %v983_v61 = vld [vmem:[%s1515_s7 + $0x28] sm:$0xf] }
   0xa   :  { %1184 = vmatprep.subr.bf16.mxu1 %v1225_v0  ;;  %1198 = vmatpush3.bf16.msra.mxu0 %v1197_v27  ;;  %v309_v35 = vld [vmem:[%s1515_s7] sm:$0xff]  ;;  %v988_v5 = vld [vmem:[%s1512_s5 + $0x30] sm:$0xff]  ;;  %v989_v6 = vld [vmem:[%s1512_s5 + $0x38] sm:$0xff] }
   0xb   :  { %1107 = vmatprep.subr.mxu0 %v1227_v3  ;;  %v1200_v40 = vpack.c.bf16 %v310_v36, %v309_v35  ;;  %v968_v43 = vld [vmem:[%s1516_s6] ss:$0 sm:$0xff]  ;;  %v978_v62 = vld [vmem:[%s1516_s6 + $0x1] ss:$0 sm:$0xff]  ;;  %v1209_v7 = vpack.c.bf16 %v989_v6, %v988_v5  ;;  %v995_v9 = vld [vmem:[%s1515_s7 + $0x30] sm:$0xff] }
   0xc   :  { %v975_v49 = vld [vmem:[%s1512_s5 + $0x20] sm:$0xff]  ;;  %v996_v10 = vld [vmem:[%s1515_s7 + $0x38] sm:$0xff]  ;;  %v1009_v27 = vld [vmem:[%s1515_s7 + $0x48] sm:$0xff] }
   0xd   :  { %1186 = vmatpush3.bf16.msra.mxu1 %v1185_v14  ;;  %v1203_v50 = vpack.c.bf16 %v975_v49, %v974_v48  ;;  %v971_v52 = vld [vmem:[%s1517_s8] ss:$0 sm:$0xff]  ;;  %v1212_v11 = vpack.c.bf16 %v996_v10, %v995_v9  ;;  %v985_v12 = vld [vmem:[%s1517_s8 + $0x1] ss:$0 sm:$0xff]  ;;  %v992_v19 = vld [vmem:[%s1516_s6 + $0x2] ss:$0 sm:$0xff] }
   0xe   :  { %1187 = vmatprep.subr.bf16.mxu1 %v1225_v0  ;;  %1108 = vmatpush3.msk.msra.mxu0 %vm234_vm3, %v222_v33  ;;  %v982_v57 = vld [vmem:[%s1515_s7 + $0x20] sm:$0xff]  ;;  %v1004_v26 = vld [vmem:[%s1512_s5 + $0x58] sm:$0xf] }
   0xf   :  { %1199 = vmatprep.subr.bf16.mxu0 %v1225_v0  ;;  %v1206_v59 = vpack.c.bf16 %v982_v57, %v981_v56  ;;  %v990_v8 = vld [vmem:[%s1512_s5 + $0x40] sm:$0xf]  ;;  %v1011_v36 = vld [vmem:[%s1515_s7 + $0x58] sm:$0xf] }
  0x10   :  { %v997_v18 = vld [vmem:[%s1515_s7 + $0x40] sm:$0xf] }
  0x11   :  { %1189 = vmatpush3.bf16.msra.mxu1 %v1188_v17 }
  0x12   :  { %1190 = vmatprep.subr.bf16.mxu1 %v1225_v0 }
  0x15   :  { %1192 = vmatpush3.bf16.msra.mxu1 %v1191_v20 }
  0x16   :  { %1193 = vmatprep.subr.bf16.mxu1 %v1225_v0 }
  0x19   :  { %1195 = vmatpush3.bf16.msra.mxu1 %v1194_v23 }
  0x1a   :  { %1098 = vmatprep.subr.mxu1 %v1227_v3 }
  0x1d   :  { %1099 = vmatpush3.msra.mxu1 %v137_v24  ;;  %v1002_v24 = vld [vmem:[%s1512_s5 + $0x48] sm:$0xff] }
  0x1e   :  { %1208 = vmatprep.subr.bf16.mxu1 %v1225_v0 }
  0xda   :  { %v120_v29 = vpop.f32.mrb[0].mxu0 }
  0xdb   :  { %v121_v30 = vadd.f32 %v964_v28, %v120_v29  ;;  %v1073_v31 = vpop.f32.mrb[1].mxu0  ;;  %v1010_v28 = vld [vmem:[%s1515_s7 + $0x50] sm:$0xff] }
  0xdc   :  { %v1218_v29 = vpack.c.bf16 %v1010_v28, %v1009_v27 }
  0xdd   :  { %v124_v32 = vmax.f32 %v121_v30, 0.0  ;;  %v999_v30 = vld [vmem:[%s1517_s8 + $0x2] ss:$0 sm:$0xff] }
  0xdf   :  { %1101 = vmatmul.mubr.msk.f32.vlgmr.msra.gmra.mrb[0].mxu1 %vm145_vm2, %v124_v32 }
  0xe0   :  { %1145 = vmatprep.mubr.msk.f32.mxu1 %vm1226_vm0, %v1227_v3  ;;  %1210 = vmatpush3.bf16.msra.mxu1 %v1209_v7 }
  0xe1   :  { %1143 = vmatprep.subr.mxu1 %v1227_v3 }
  0xe4   :  { %1144 = vmatpush3.msk.msra.mxu1 %vm234_vm3, %v990_v8 }
  0xe5   :  { %1214 = vmatprep.subr.bf16.mxu1 %v1225_v0 }
 0x1b2   :  { %v215_v37 = vpop.f32.mrb[0].mxu1 }
 0x1b3   :  { %v216_v38 = vadd.f32 %v966_v34, %v215_v37  ;;  %v1102_v39 = vpop.f32.mrb[1].mxu1 }
 0x1b5   :  { %v219_v41 = vmax.f32 %v216_v38, 0.0 }
 0x1b7   :  { %1110 = vmatmul.mubr.msk.f32.vlgmr.msra.gmra.mrb[2].mxu0 %vm230_vm4, %v219_v41 }
 0x1b8   :  { %1201 = vmatpush3.bf16.msra.mxu0 %v1200_v40  ;;  %1118 = vmatprep.mubr.msk.f32.mxu0 %vm1226_vm0, %v1227_v3 }
 0x1b9   :  { %1116 = vmatprep.subr.mxu0 %v1227_v3 }
 0x1bc   :  { %1117 = vmatpush3.msk.msra.mxu0 %vm234_vm3, %v311_v42  ;;  %v1013_v42 = vld [vmem:[%s1517_s8 + $0x3] ss:$0 sm:$0xff] }
 0x1bd   :  { %1202 = vmatprep.subr.bf16.mxu0 %v1225_v0 }
 0x28a   :  { %v304_v44 = vpop.f32.mrb[2].mxu0 }
 0x28b   :  { %v305_v45 = vadd.f32 %v968_v43, %v304_v44  ;;  %v1111_v46 = vpop.f32.mrb[3].mxu0 }
 0x28d   :  { %v308_v47 = vmax.f32 %v305_v45, 0.0 }
 0x28f   :  { %1119 = vmatmul.mubr.msk.f32.vlgmr.msra.gmra.mrb[4].mxu0 %vm230_vm4, %v308_v47  ;;  %v1016_v47 = vld [vmem:[%s1519_s9] ss:$0 sm:$0xff] }
 0x290   :  { %1127 = vmatprep.mubr.msk.f32.mxu0 %vm1226_vm0, %v1227_v3  ;;  %1204 = vmatpush3.bf16.msra.mxu0 %v1203_v50 }
 0x291   :  { %1125 = vmatprep.subr.mxu0 %v1227_v3 }
 0x294   :  { %1126 = vmatpush3.msk.msra.mxu0 %vm234_vm3, %v976_v51  ;;  %v1228_v51 = vmov 0  }
 0x295   :  { %1205 = vmatprep.subr.bf16.mxu0 %v1225_v0  ;;  %1224 = vset.pattern.permute.xlu0 %v1228_v51 }
 0x362   :  { %v391_v53 = vpop.f32.mrb[4].mxu0 }
 0x363   :  { %v392_v54 = vadd.f32 %v971_v52, %v391_v53  ;;  %v1120_v55 = vpop.f32.mrb[5].mxu0 }
 0x365   :  { %v395_v58 = vadd.f32 %v392_v54, %v219_v41  ;;  %v16_v41 = vstv %s1518_s10 }
 0x366   :  { %17 = vst [vmem:[#allocation2] sm:$0x1] %v16_v41 }
 0x367   :  { %v396_v60 = vmax.f32 %v395_v58, 0.0 }
 0x369   :  { %1128 = vmatmul.mubr.msk.f32.vlgmr.msra.gmra.mrb[6].mxu0 %vm230_vm4, %v396_v60 }
 0x36a   :  { %1207 = vmatpush3.bf16.msra.mxu0 %v1206_v59  ;;  %1136 = vmatprep.mubr.msk.f32.mxu0 %vm1226_vm0, %v1227_v3 }
 0x36b   :  { %1134 = vmatprep.subr.mxu0 %v1227_v3 }
 0x36d   :  { %v1017_v52 = vld [vmem:[#allocation2] ss:$0 sm:$0xff] }
 0x36e   :  { %1135 = vmatpush3.msk.msra.mxu0 %vm234_vm3, %v983_v61 }
 0x36f   :  { %1211 = vmatprep.subr.bf16.mxu0 %v1225_v0 }
 0x43c   :  { %v481_v63 = vpop.f32.mrb[6].mxu0 }
 0x43d   :  { %v482_v1 = vadd.f32 %v978_v62, %v481_v63  ;;  %v1129_v2 = vpop.f32.mrb[7].mxu0 }
 0x43f   :  { %v485_v4 = vmax.f32 %v482_v1, 0.0 }
 0x441   :  { %1137 = vmatmul.mubr.msk.f32.vlgmr.msra.gmra.mrb[8].mxu0 %vm230_vm4, %v485_v4 }
 0x442   :  { %1154 = vmatprep.mubr.msk.f32.mxu0 %vm1226_vm0, %v1227_v3  ;;  %1213 = vmatpush3.bf16.msra.mxu0 %v1212_v11 }
 0x443   :  { %1152 = vmatprep.subr.mxu0 %v1227_v3 }
 0x446   :  { %1153 = vmatpush3.msk.msra.mxu0 %vm234_vm3, %v997_v18 }
 0x447   :  { %1217 = vmatprep.subr.bf16.mxu0 %v1225_v0  ;;  %v1003_v0 = vld [vmem:[%s1512_s5 + $0x50] sm:$0xff] }
 0x448   :  { %v1215_v25 = vpack.c.bf16 %v1003_v0, %v1002_v24 }
 0x514   :  { %v570_v13 = vpop.f32.mrb[8].mxu0 }
 0x515   :  { %v571_v14 = vadd.f32 %v985_v12, %v570_v13  ;;  %v1138_v15 = vpop.f32.mrb[9].mxu0 }
 0x517   :  { %v574_v16 = vadd.f32 %v571_v14, %v396_v60 }
 0x519   :  { %v575_v17 = vmax.f32 %v574_v16, 0.0 }
 0x51b   :  { %1146 = vmatmul.mubr.msk.f32.vlgmr.msra.gmra.mrb[2].mxu1 %vm230_vm4, %v575_v17 }
 0x51c   :  { %1163 = vmatprep.mubr.msk.f32.mxu1 %vm1226_vm0, %v1227_v3  ;;  %1216 = vmatpush3.bf16.msra.mxu1 %v1215_v25 }
 0x51d   :  { %1161 = vmatprep.subr.mxu1 %v1227_v3 }
 0x520   :  { %1162 = vmatpush3.msk.msra.mxu1 %vm234_vm3, %v1004_v26 }
 0x5ee   :  { %v660_v20 = vpop.f32.mrb[2].mxu1 }
 0x5ef   :  { %v661_v21 = vadd.f32 %v992_v19, %v660_v20  ;;  %v1147_v22 = vpop.f32.mrb[3].mxu1 }
 0x5f1   :  { %v664_v23 = vmax.f32 %v661_v21, 0.0 }
 0x5f3   :  { %1155 = vmatmul.mubr.msk.f32.vlgmr.msra.gmra.mrb[10].mxu0 %vm230_vm4, %v664_v23 }
 0x5f4   :  { %1172 = vmatprep.mubr.msk.f32.mxu0 %vm1226_vm0, %v1227_v3  ;;  %1219 = vmatpush3.bf16.msra.mxu0 %v1218_v29 }
 0x5f5   :  { %1170 = vmatprep.subr.mxu0 %v1227_v3  ;;  %v1006_v3 = vld [vmem:[%s1516_s6 + $0x3] ss:$0 sm:$0xff] }
 0x5f8   :  { %1171 = vmatpush3.msk.msra.mxu0 %vm234_vm3, %v1011_v36 }
 0x6c6   :  { %v749_v31 = vpop.f32.mrb[10].mxu0 }
 0x6c7   :  { %v750_v32 = vadd.f32 %v999_v30, %v749_v31  ;;  %v1156_v33 = vpop.f32.mrb[11].mxu0 }
 0x6c9   :  { %v753_v34 = vadd.f32 %v750_v32, %v575_v17 }
 0x6cb   :  { %v754_v35 = vmax.f32 %v753_v34, 0.0 }
 0x6cd   :  { %1164 = vmatmul.mubr.msk.f32.vlgmr.msra.gmra.mrb[4].mxu1 %vm230_vm4, %v754_v35 }
 0x7a0   :  { %v839_v37 = vpop.f32.mrb[4].mxu1 }
 0x7a1   :  { %v840_v38 = vadd.f32 %v1006_v3, %v839_v37  ;;  %v1165_v39 = vpop.f32.mrb[5].mxu1 }
 0x7a3   :  { %v843_v40 = vmax.f32 %v840_v38, 0.0 }
 0x7a5   :  { %1173 = vmatmul.mubr.msk.f32.vlgmr.msra.gmra.mrb[12].mxu0 %vm230_vm4, %v843_v40 }
 0x878   :  { %v928_v43 = vpop.f32.mrb[12].mxu0 }
 0x879   :  { %v929_v44 = vadd.f32 %v1013_v42, %v928_v43  ;;  %v1174_v45 = vpop.f32.mrb[13].mxu0 }
 0x87b   :  { %v932_v46 = vadd.f32 %v929_v44, %v754_v35 }
 0x87d   :  { %v933_v48 = vmax.f32 %v932_v46, 0.0 }
 0x87f   :  { %v941_v49 = vmul.f32 %v1016_v47, %v933_v48 }
 0x881   :  { %v942_v50 = vsel %vm230_vm4, %v941_v49, 0.0 }
 0x882   :  { %943 = vadd.xlane.f32.xlu0 %v942_v50 }
 0x90f   :  { %v944_v53 = vpop.xlane.xlu0 %943 }
 0x910   :  { %v952_v54 = vadd.f32 %v1017_v52, %v944_v53 }
 0x912   :  { %v953_v55 = vmax.f32 %v952_v54, 0.0 }
 0x914   :  { %956 = vperm.xlu0 %1224, %v953_v55  }
 0x993   :  { %v957_v56 = vpop.permute.xlu0 %956 }
 0x994   :  { %959 = vst [vmem:[%s1520_s11] sm:$0xff] %v957_v56 }

</bundles_post_ra>
